<compile_context>
chip_gen: v6e
topology: v6e:2x2x1
jax: 0.10.0
libtpu: 0.0.40
codegen_flags: <defaults>
</compile_context>

<pallas_src>
import functools

import jax
import jax.numpy as jnp
from jax import lax
from jax.experimental import pallas as pl
from jax.experimental.pallas import tpu as pltpu

_LANE = 128


def _cdiv(a, b):
    return -(-a // b)


def _round_up(a, b):
    return _cdiv(a, b) * b


def _vmem_capacity_bytes():
    # Generation query; fall back to the v5e/v6e physical size if unavailable.
    try:
        return int(pltpu.get_tpu_info().vmem_capacity_bytes)
    except Exception:
        return 128 * 1024 * 1024


def _choose_tiles(B, d, itemsize, vmem_budget):
    """Pick (TB, TD) so 4 inputs x 2 buffers + f32 temporaries fit the budget."""
    d_pad_full = _round_up(max(d, 1), _LANE)
    # 4 inputs x 2 pipeline buffers at the input dtype + ~3 f32-sized
    # elementwise temporaries live inside the kernel, per (row x padded lane).
    per_elem_bytes = 8 * itemsize + 3 * 4

    if d_pad_full * per_elem_bytes * 8 <= vmem_budget:
        td = d                          # whole feature axis per grid step
        d_pad = d_pad_full
    else:
        # Huge d: tile the feature axis (multiples of 128 lanes) so at least
        # ~64 rows fit per step; accumulate partial distances in scratch.
        td = max(_LANE,
                 (vmem_budget // (64 * per_elem_bytes)) // _LANE * _LANE)
        d_pad = td

    rows_budget = max(8, vmem_budget // (d_pad * per_elem_bytes))
    # Cap per-input per-step block at ~4 MiB (HBM streaming sweet spot).
    rows_cap = max(8, (4 * 1024 * 1024) // (d_pad * itemsize))
    tb = max(8, (min(rows_budget, rows_cap) // 8) * 8)
    return tb, td


def make_quadruplet_loss_kernel(margin1, margin2, tb, td, batch, feat,
                                num_d_tiles, need_row_mask, need_col_mask):
    m1 = float(margin1)
    m2 = float(margin2)
    f32 = jnp.float32

    def kernel(a_ref, p_ref, n1_ref, n2_ref, out_ref, *acc):
        k = pl.program_id(1)

        if need_col_mask:
            col = k * td + lax.broadcasted_iota(jnp.int32, (tb, td), 1)
            cmask = col < feat

            def diff(x_ref, y_ref):
                dd = x_ref[...].astype(f32) - y_ref[...].astype(f32)
                return jnp.where(cmask, dd, 0.0)
        else:
            def diff(x_ref, y_ref):
                return x_ref[...].astype(f32) - y_ref[...].astype(f32)

        # Fused distance partials: never hold four full f32 blocks live.
        d_ap = jnp.sum(jnp.square(diff(a_ref, p_ref)), axis=-1, keepdims=True)
        d_an1 = jnp.sum(jnp.square(diff(a_ref, n1_ref)), axis=-1, keepdims=True)
        d_nn = jnp.sum(jnp.square(diff(n1_ref, n2_ref)), axis=-1, keepdims=True)

        def finalize(ap, an1, nn):
            loss = (jnp.maximum(ap - an1 + m1, 0.0)
                    + jnp.maximum(ap - nn + m2, 0.0))
            if need_row_mask:
                i = pl.program_id(0)
                row = i * tb + lax.broadcasted_iota(jnp.int32, (tb, 1), 0)
                loss = jnp.where(row < batch, loss, 0.0)
            out_ref[...] = jnp.sum(loss, keepdims=True)

        if num_d_tiles == 1:
            finalize(d_ap, d_an1, d_nn)
        else:
            ap_acc, an1_acc, nn_acc = acc

            @pl.when(k == 0)
            def _():
                ap_acc[...] = jnp.zeros_like(ap_acc)
                an1_acc[...] = jnp.zeros_like(an1_acc)
                nn_acc[...] = jnp.zeros_like(nn_acc)

            ap_acc[...] += d_ap
            an1_acc[...] += d_an1
            nn_acc[...] += d_nn

            @pl.when(k == pl.num_programs(1) - 1)
            def _():
                finalize(ap_acc[...], an1_acc[...], nn_acc[...])

    return kernel


@functools.partial(jax.jit, static_argnames=("margin1", "margin2"))
def quadruplet_loss(anchor, pos, neg1, neg2,
                    margin1: float = 1.0, margin2: float = 1.0):
    B, d = anchor.shape
    itemsize = jnp.dtype(anchor.dtype).itemsize

    # Generation-aware VMEM budget: v7x has 64 MiB/TC, v5e/v6e have 128 MiB.
    vmem_cap = _vmem_capacity_bytes()
    if vmem_cap <= 64 * 1024 * 1024:            # v7x-class
        vmem_budget = 32 * 1024 * 1024
        vmem_limit = 44 * 1024 * 1024
    else:                                        # v5e / v6e
        vmem_budget = 48 * 1024 * 1024
        vmem_limit = 64 * 1024 * 1024

    TB, TD = _choose_tiles(B, d, itemsize, vmem_budget)

    if TB >= B:
        TB = B
        # Whole batch would fit one tile: still split into >=2 (typically 4)
        # tiles when data is big, so v7x megacore can shard the "parallel"
        # axis and double-buffering / DMA overlap stays engaged.
        if B >= 32 and B * d * itemsize >= 2 * 1024 * 1024:
            TB = min(B, _round_up(_cdiv(B, 4), 8))

    num_b_tiles = _cdiv(B, TB)
    num_d_tiles = _cdiv(d, TD)
    need_row_mask = (B % TB) != 0
    need_col_mask = (d % TD) != 0

    kernel = make_quadruplet_loss_kernel(
        margin1, margin2, TB, TD, B, d,
        num_d_tiles, need_row_mask, need_col_mask)

    in_spec = pl.BlockSpec((TB, TD), lambda i, k: (i, k))
    out_spec = pl.BlockSpec((1, 1), lambda i, k: (i, 0))
    scratch = ([pltpu.VMEM((TB, 1), jnp.float32)] * 3) if num_d_tiles > 1 else []

    partials = pl.pallas_call(
        kernel,
        out_shape=jax.ShapeDtypeStruct((num_b_tiles, 1), jnp.float32),
        grid=(num_b_tiles, num_d_tiles),
        in_specs=[in_spec, in_spec, in_spec, in_spec],
        out_specs=out_spec,
        scratch_shapes=scratch,
        compiler_params=pltpu.CompilerParams(
            dimension_semantics=("parallel", "arbitrary"),
            vmem_limit_bytes=vmem_limit,
        ),
        cost_estimate=pl.CostEstimate(
            flops=10 * B * d,
            transcendentals=0,
            bytes_accessed=4 * B * d * itemsize + 4 * num_b_tiles,
        ),
    )(anchor, pos, neg1, neg2)

    # Tiny final reduction over per-tile partial sums; divide by the true B.
    return jnp.sum(partials) * (1.0 / B)


def quadruplet_loss_ref(anchor, pos, neg1, neg2, margin1=1.0, margin2=1.0):
    def dist(x1, x2):
        return jnp.sum((x1 - x2) ** 2, axis=-1)
    a = anchor.astype(jnp.float32)
    p = pos.astype(jnp.float32)
    n1 = neg1.astype(jnp.float32)
    n2 = neg2.astype(jnp.float32)
    loss = jax.nn.relu(dist(a, p) - dist(a, n1) + margin1)
    loss = loss + jax.nn.relu(dist(a, p) - dist(n1, n2) + margin2)
    return jnp.mean(loss)


if __name__ == "__main__":
    key = jax.random.PRNGKey(0)
    B, d = 8, 32
    k1, k2, k3, k4 = jax.random.split(key, 4)
    anchor = jax.random.normal(k1, (B, d), dtype=jnp.float32)
    pos    = jax.random.normal(k2, (B, d), dtype=jnp.float32)
    neg1   = jax.random.normal(k3, (B, d), dtype=jnp.float32)
    neg2   = jax.random.normal(k4, (B, d), dtype=jnp.float32)

    out = quadruplet_loss(anchor, pos, neg1, neg2, margin1=1.0, margin2=1.0)
    jax.block_until_ready(out)

    ref = quadruplet_loss_ref(anchor, pos, neg1, neg2, 1.0, 1.0)
    assert jnp.allclose(out, ref, rtol=1e-5, atol=1e-5), (out, ref)
    print("KERNEL_OK")
</pallas_src>

<mosaic_0001>
module attributes {stable_mosaic.version = 11 : i64} {
  func.func @kernel(%arg0: i32, %arg1: i32, %arg2: memref<8x32xf32, #tpu.memory_space<vmem>>, %arg3: memref<8x32xf32, #tpu.memory_space<vmem>>, %arg4: memref<8x32xf32, #tpu.memory_space<vmem>>, %arg5: memref<8x32xf32, #tpu.memory_space<vmem>>, %arg6: memref<1x1xf32, #tpu.memory_space<vmem>>) attributes {dimension_semantics = [#tpu.dimension_semantics<parallel>, #tpu.dimension_semantics<arbitrary>], iteration_bounds = array<i64: 1, 1>, scalar_prefetch = 0 : i64, scratch_operands = 0 : i64, tpu.core_type = #tpu.core_type<tc>, window_params = [{transform_indices = @transform_0, window_bounds = array<i64: 8, 32>}, {transform_indices = @transform_1, window_bounds = array<i64: 8, 32>}, {transform_indices = @transform_2, window_bounds = array<i64: 8, 32>}, {transform_indices = @transform_3, window_bounds = array<i64: 8, 32>}, {transform_indices = @transform_4, window_bounds = array<i64: 1, 1>}]} {
    %c0 = arith.constant 0 : index
    %c0_0 = arith.constant 0 : index
    %0 = vector.load %arg2[%c0, %c0_0] : memref<8x32xf32, #tpu.memory_space<vmem>>, vector<8x32xf32>
    %c0_1 = arith.constant 0 : index
    %c0_2 = arith.constant 0 : index
    %1 = vector.load %arg3[%c0_1, %c0_2] : memref<8x32xf32, #tpu.memory_space<vmem>>, vector<8x32xf32>
    %2 = arith.subf %0, %1 : vector<8x32xf32>
    %3 = arith.mulf %2, %2 : vector<8x32xf32>
    %cst = arith.constant dense<0.000000e+00> : vector<8xf32>
    %4 = vector.multi_reduction <add>, %3, %cst [1] : vector<8x32xf32> to vector<8xf32>
    %5 = vector.shape_cast %4 : vector<8xf32> to vector<8x1xf32>
    %c0_3 = arith.constant 0 : index
    %c0_4 = arith.constant 0 : index
    %6 = vector.load %arg2[%c0_3, %c0_4] : memref<8x32xf32, #tpu.memory_space<vmem>>, vector<8x32xf32>
    %c0_5 = arith.constant 0 : index
    %c0_6 = arith.constant 0 : index
    %7 = vector.load %arg4[%c0_5, %c0_6] : memref<8x32xf32, #tpu.memory_space<vmem>>, vector<8x32xf32>
    %8 = arith.subf %6, %7 : vector<8x32xf32>
    %9 = arith.mulf %8, %8 : vector<8x32xf32>
    %cst_7 = arith.constant dense<0.000000e+00> : vector<8xf32>
    %10 = vector.multi_reduction <add>, %9, %cst_7 [1] : vector<8x32xf32> to vector<8xf32>
    %11 = vector.shape_cast %10 : vector<8xf32> to vector<8x1xf32>
    %c0_8 = arith.constant 0 : index
    %c0_9 = arith.constant 0 : index
    %12 = vector.load %arg4[%c0_8, %c0_9] : memref<8x32xf32, #tpu.memory_space<vmem>>, vector<8x32xf32>
    %c0_10 = arith.constant 0 : index
    %c0_11 = arith.constant 0 : index
    %13 = vector.load %arg5[%c0_10, %c0_11] : memref<8x32xf32, #tpu.memory_space<vmem>>, vector<8x32xf32>
    %14 = arith.subf %12, %13 : vector<8x32xf32>
    %15 = arith.mulf %14, %14 : vector<8x32xf32>
    %cst_12 = arith.constant dense<0.000000e+00> : vector<8xf32>
    %16 = vector.multi_reduction <add>, %15, %cst_12 [1] : vector<8x32xf32> to vector<8xf32>
    %17 = vector.shape_cast %16 : vector<8xf32> to vector<8x1xf32>
    %18 = arith.subf %5, %11 : vector<8x1xf32>
    %cst_13 = arith.constant 1.000000e+00 : f32
    %19 = vector.broadcast %cst_13 : f32 to vector<8x1xf32>
    %20 = arith.addf %18, %19 : vector<8x1xf32>
    %cst_14 = arith.constant 0.000000e+00 : f32
    %21 = vector.broadcast %cst_14 : f32 to vector<8x1xf32>
    %22 = arith.maximumf %20, %21 : vector<8x1xf32>
    %23 = arith.subf %5, %17 : vector<8x1xf32>
    %cst_15 = arith.constant 1.000000e+00 : f32
    %24 = vector.broadcast %cst_15 : f32 to vector<8x1xf32>
    %25 = arith.addf %23, %24 : vector<8x1xf32>
    %cst_16 = arith.constant 0.000000e+00 : f32
    %26 = vector.broadcast %cst_16 : f32 to vector<8x1xf32>
    %27 = arith.maximumf %25, %26 : vector<8x1xf32>
    %28 = arith.addf %22, %27 : vector<8x1xf32>
    %29 = vector.shape_cast %28 : vector<8x1xf32> to vector<1x8x1xf32>
    %cst_17 = arith.constant dense<0.000000e+00> : vector<1xf32>
    %30 = vector.multi_reduction <add>, %29, %cst_17 [1, 2] : vector<1x8x1xf32> to vector<1xf32>
    %31 = vector.shape_cast %30 : vector<1xf32> to vector<1x1x1xf32>
    %32 = vector.extract %31[0, 0, 0] : f32 from vector<1x1x1xf32>
    %33 = vector.broadcast %32 : f32 to vector<1x1xf32>
    %c0_18 = arith.constant 0 : index
    %c0_19 = arith.constant 0 : index
    %34 = vector.load %arg6[%c0_18, %c0_19] : memref<1x1xf32, #tpu.memory_space<vmem>>, vector<1x1xf32>
    tpu.vector_store %arg6[%c0_18, %c0_19], %33 {strides = array<i32>} : memref<1x1xf32, #tpu.memory_space<vmem>>, vector<1x1xf32>,
    return
  }
  func.func @transform_0(%arg0: i32, %arg1: i32) -> (i32, i32) {
    %c0_i32 = arith.constant 0 : i32
    return %arg0, %arg1 : i32, i32
  }
  func.func @transform_1(%arg0: i32, %arg1: i32) -> (i32, i32) {
    %c0_i32 = arith.constant 0 : i32
    return %arg0, %arg1 : i32, i32
  }
  func.func @transform_2(%arg0: i32, %arg1: i32) -> (i32, i32) {
    %c0_i32 = arith.constant 0 : i32
    return %arg0, %arg1 : i32, i32
  }
  func.func @transform_3(%arg0: i32, %arg1: i32) -> (i32, i32) {
    %c0_i32 = arith.constant 0 : i32
    return %arg0, %arg1 : i32, i32
  }
  func.func @transform_4(%arg0: i32, %arg1: i32) -> (i32, i32) {
    %c0_i32 = arith.constant 0 : i32
    %c0_i32_0 = arith.constant 0 : i32
    return %arg0, %c0_i32 : i32, i32
  }
}

</mosaic_0001>

<bundles_post_ra>
// kernel: quadruplet_loss.1
= control target key start
LH: loop header
LB: loop body
LE: loop exit
PB: predicated region body
PF: predicated region fallthrough
CT: control target
= control target key end

     0   :  { %9 = vsyncpa [#allocation3], 0  ;;  %s283_s0 = inlined_call_operand.hbm [shape: f32[8,32], index: 0, kind: input, shape index: {}]   ;;  %s284_s1 = inlined_call_operand.hbm [shape: f32[8,32], index: 1, kind: input, shape index: {}]   ;;  %s285_s2 = inlined_call_operand.hbm [shape: f32[8,32], index: 2, kind: input, shape index: {}]   ;;  %s286_s3 = inlined_call_operand.hbm [shape: f32[8,32], index: 3, kind: input, shape index: {}]   ;;  %s287_s4 = inlined_call_operand.hbm [shape: f32[1,1], index: 4, kind: output, shape index: {}]  }
   0x1   :  { %10 = vsyncpa [#allocation6], 0 }
   0x2   :  { %11 = vsyncpa [#allocation9], 0 }
   0x3   :  { %12 = vsyncpa [#allocation4], 0  ;;  %s238_s15 = smov [#allocation5]   ;;  %s239_s17 = smov [#allocation2]  }
   0x4   :  { %s29_s16 = sshll.u32 %s238_s15, 4  ;;  %s19_s18 = sshll.u32 %s239_s17, 4  ;;  %s30_s16 = int_to_ptr.vmem [resolvable:$true] %s29_s16  ;;  %s20_s18 = int_to_ptr.vmem [resolvable:$true] %s19_s18 }
   0x5   :  { %s138_s19 = scalar_lea.vmem %s30_s16, 128  ;;  %p143_p1 = scmp.lt.s32.totalorder %s30_s16, %s30_s16 }
   0x6   :  { %p139_p0 = scmp.ne.s32.totalorder %s30_s16, %s138_s19  ;;  %p144_p2 = scmp.lt.s32.totalorder %s138_s19, %s138_s19 }
   0x8   :  { %p145_p3 = por %p144_p2, %p143_p1 }
   0xa   :  { %p146_p4 = pnand %p145_p3, %p139_p0 }
   0xc   :  { %149 = shalt.err (!%p146_p4)
}
   0xd   :  { %32 = dma.hbm_to_vmem [thread:$0]  %s284_s1, 128, %s30_s16, [#allocation6]  }
   0xe   :  { %s158_s22 = scalar_lea.vmem %s20_s18, 128  ;;  %p163_p6 = scmp.lt.s32.totalorder %s20_s18, %s20_s18 }
   0xf   :  { %p159_p5 = scmp.ne.s32.totalorder %s20_s18, %s158_s22  ;;  %p164_p7 = scmp.lt.s32.totalorder %s158_s22, %s158_s22 }
  0x11   :  { %p165_p8 = por %p164_p7, %p163_p6 }
  0x13   :  { %p166_p9 = pnand %p165_p8, %p159_p5 }
  0x15   :  { %169 = shalt.err (!%p166_p9)
}
  0x16   :  { %22 = dma.hbm_to_vmem [thread:$0]  %s283_s0, 128, %s20_s18, [#allocation3]  }
  0x17   :  { %s240_s25 = smov [#allocation7]   ;;  %s241_s27 = smov [#allocation8]  }
  0x18   :  { %s39_s26 = sshll.u32 %s240_s25, 4  ;;  %s49_s28 = sshll.u32 %s241_s27, 4  ;;  %s40_s26 = int_to_ptr.vmem [resolvable:$true] %s39_s26  ;;  %s50_s28 = int_to_ptr.vmem [resolvable:$true] %s49_s28 }
  0x19   :  { %s178_s29 = scalar_lea.vmem %s40_s26, 128  ;;  %p183_p11 = scmp.lt.s32.totalorder %s40_s26, %s40_s26 }
  0x1a   :  { %p179_p10 = scmp.ne.s32.totalorder %s40_s26, %s178_s29  ;;  %p184_p12 = scmp.lt.s32.totalorder %s178_s29, %s178_s29 }
  0x1c   :  { %p185_p13 = por %p184_p12, %p183_p11 }
  0x1e   :  { %p186_p0 = pnand %p185_p13, %p179_p10 }
  0x20   :  { %189 = shalt.err (!%p186_p0)
}
  0x21   :  { %42 = dma.hbm_to_vmem [thread:$0]  %s285_s2, 128, %s40_s26, [#allocation6]  }
  0x22   :  { %s198_s5 = scalar_lea.vmem %s50_s28, 128  ;;  %p203_p2 = scmp.lt.s32.totalorder %s50_s28, %s50_s28 }
  0x23   :  { %p199_p1 = scmp.ne.s32.totalorder %s50_s28, %s198_s5  ;;  %p204_p3 = scmp.lt.s32.totalorder %s198_s5, %s198_s5 }
  0x25   :  { %p205_p4 = por %p204_p3, %p203_p2 }
  0x27   :  { %p206_p5 = pnand %p205_p4, %p199_p1 }
  0x29   :  { %209 = shalt.err (!%p206_p5)
}
  0x2a   :  { %52 = dma.hbm_to_vmem [thread:$0]  %s286_s3, 128, %s50_s28, [#allocation9]  }
  0x2b   :  { %230 = dma.done.wait [#allocation3], 128  }
  0x2c   :  { %231 = vsyncadd [#allocation3], 4294967168 }
  0x2d   :  { %232 = dma.done.wait [#allocation6], 256  }
  0x2e   :  { %233 = vsyncadd [#allocation6], 4294967040 }
  0x2f   :  { %234 = dma.done.wait [#allocation9], 128  }
  0x30   :  { %235 = vsyncadd [#allocation9], 4294967168  ;;  %v73_v0 = vld [vmem:[#allocation7] sm:$0xff]  ;;  %v79_v1 = vld [vmem:[#allocation8] sm:$0xff]  ;;  %vm69_vm0 = vcmask 261120   ;;  %vm92_vm1 = vcmask 7168  }
  0x31   :  { %v65_v2 = vld [vmem:[#allocation2] sm:$0xff]  ;;  %v80_v3 = vsub.f32 %v73_v0, %v79_v1  ;;  %v66_v4 = vld [vmem:[#allocation5] sm:$0xff]  ;;  %s242_s2 = smov [#allocation10]   ;;  %vm104_vm2 = vcmask 0  }
  0x32   :  { %v74_v5 = vsub.f32 %v65_v2, %v73_v0  ;;  %v67_v6 = vsub.f32 %v65_v2, %v66_v4  ;;  %s112_s3 = sshll.u32 %s242_s2, 4  ;;  %s113_s3 = int_to_ptr.vmem [resolvable:$true] %s112_s3 }
  0x33   :  { %v81_v7 = vmul.f32 %v80_v3, %v80_v3  ;;  %s210_s8 = scalar_lea.vmem %s113_s3, 16  ;;  %s214_s9 = scalar_lea.vmem %s113_s3, 32 }
  0x34   :  { %v68_v8 = vmul.f32 %v67_v6, %v67_v6  ;;  %v75_v9 = vmul.f32 %v74_v5, %v74_v5  ;;  %p211_p6 = scmp.ne.s32.totalorder %s113_s3, %s210_s8  ;;  %p215_p7 = scmp.lt.s32.totalorder %s113_s3, %s113_s3 }
  0x35   :  { %v82_v10 = vsel %vm69_vm0, %v81_v7, 0.0  ;;  %p216_p8 = scmp.lt.s32.totalorder %s214_s9, %s210_s8 }
  0x36   :  { %83 = vadd.xlane.f32.xlu1 %v82_v10  ;;  %v70_v11 = vsel %vm69_vm0, %v68_v8, 0.0  ;;  %v76_v12 = vsel %vm69_vm0, %v75_v9, 0.0 }
  0x37   :  { %71 = vadd.xlane.f32.xlu0 %v70_v11  ;;  %p217_p9 = por %p216_p8, %p215_p7 }
  0x39   :  { %p218_p10 = pnand %p217_p9, %p211_p6 }
  0x3b   :  { %77 = vadd.xlane.f32.xlu0 %v76_v12 }
  0xbf   :  { %v84_v13 = vpop.xlane.xlu1 %83 }
  0xc0   :  { %v72_v14 = vpop.xlane.xlu0 %71 }
  0xc1   :  { %v88_v15 = vsub.f32 %v72_v14, %v84_v13 }
  0xc3   :  { %v89_v17 = vadd.f32 1.0, %v88_v15 }
  0xc4   :  { %v78_v16 = vpop.xlane.xlu0 %77 }
  0xc5   :  { %v85_v18 = vsub.f32 %v72_v14, %v78_v16  ;;  %v90_v20 = vmax.f32 %v89_v17, 0.0 }
  0xc7   :  { %v86_v19 = vadd.f32 1.0, %v85_v18 }
  0xc9   :  { %v87_v21 = vmax.f32 %v86_v19, 0.0 }
  0xcb   :  { %v91_v22 = vadd.f32 %v90_v20, %v87_v21 }
  0xcd   :  { %v93_v23 = vsel %vm92_vm1, %v91_v22, 0.0 }
  0xce   :  { %94 = vadd.xlane.f32.xlu1 %v93_v23 }
 0x157   :  { %v95_v24 = vpop.xlane.xlu1 %94 }
 0x158   :  { %v96_v25 = vrot.slane %v95_v24, 4 }
 0x15a   :  { %v97_v26 = vadd.f32 %v96_v25, %v95_v24 }
 0x15c   :  { %v98_v27 = vrot.slane %v97_v26, 2 }
 0x15e   :  { %v99_v28 = vadd.f32 %v98_v27, %v97_v26 }
 0x160   :  { %v100_v29 = vrot.slane %v99_v28, 1 }
 0x162   :  { %v101_v30 = vadd.f32 %v100_v29, %v99_v28 }
 0x164   :  { %123 = vpush %v101_v30 }
 0x195   :  { %s124_s7 = spop %123 }
 0x196   :  { %v103_v31 = vstv %s124_s7 }
 0x197   :  { %105 = vst.msk [vmem:[#allocation10] sm:$0x1] %vm104_vm2, %v103_v31 }
 0x198   :  { %221 = shalt.err (!%p218_p10)
}
 0x199   :  { %115 = dma.vmem_to_hbm [thread:$0]  %s113_s3, 16, %s287_s4, [#allocation4]  }
 0x19a   :  { %236 = dma.done.wait [#allocation4], 16  }
 0x19b   :  { %237 = vsyncadd [#allocation4], 4294967280 }
 0x19c   :  { %119 = vsyncpa [#allocation3], 1 }
 0x19d   :  { %120 = vsyncpa [#allocation6], 1 }
 0x19e   :  { %121 = vsyncpa [#allocation9], 1 }
 0x19f   :  { %122 = vsyncpa [#allocation4], 1 }

</bundles_post_ra>
